<compile_context>
chip_gen: v6e
topology: v6e:2x2x1
jax: 0.10.0
libtpu: 0.0.40
codegen_flags: <defaults>
</compile_context>

<pallas_src>
import jax
import jax.numpy as jnp
from jax.experimental import pallas as pl
from jax.experimental.pallas import tpu as pltpu


_NUM_DECODERS = 8
_MLP_CHANNELS = (0, 1, 2, 3, 6, 7)   # plain MoBYMLP decoders (module order 0-3, 6-7)
_CNN_CHANNELS = (4, 5)               # MultiScaleCNN decoders
_BN_EPS = 1e-5


# ----------------------------------------------------------------------------
# Parameter folding (inference-mode BatchNorm folded into Linear / Conv weights)
# ----------------------------------------------------------------------------
def _fold_mlp(p, eps=_BN_EPS):
    """MoBYMLP(num_layers=2): Linear -> BN -> ReLU -> Linear, with BN folded.
    Returns (w1f (Din,H), b1f (H,), w2 (H,), b2 scalar)."""
    scale = p["bn_gamma"] / jnp.sqrt(p["bn_var"] + eps)            # (H,)
    w1f = p["w1"].T * scale[None, :]                               # (Din, H)
    b1f = (p["b1"] - p["bn_mean"]) * scale + p["bn_beta"]          # (H,)
    return (w1f.astype(jnp.float32),
            b1f.astype(jnp.float32),
            p["w2"].reshape(-1).astype(jnp.float32),               # (H,)
            p["b2"].reshape(()).astype(jnp.float32))               # scalar


def _fold_conv_block(conv_w, conv_b, gamma, beta, mean, var,
                     kernel_sizes, out_channels, cin, max_k, eps=_BN_EPS):
    """Fold a multi-kernel-size Conv1d bank + following BatchNorm1d into a single
    per-tap weight tensor (max_k, cin, C1) and a bias (C1,).  Taps of each kernel
    size are centre-aligned inside the max_k window; unused taps are 0."""
    n_k = len(kernel_sizes)
    c1 = out_channels * n_k
    pad_l_max = (max_k - 1) // 2
    scale = gamma / jnp.sqrt(var + eps)                            # (C1,)
    w_all = jnp.zeros((max_k, cin, c1), jnp.float32)
    b_all = jnp.zeros((c1,), jnp.float32)
    for i, k in enumerate(kernel_sizes):
        sl = slice(out_channels * i, out_channels * (i + 1))
        s_blk = scale[sl]                                          # (OC,)
        w_i = conv_w[i]                                            # (OC, cin, k)
        left_i = (k - 1) // 2
        for t in range(k):
            tg = t - left_i + pad_l_max
            w_all = w_all.at[tg, :, sl].set(w_i[:, :, t].T * s_blk[None, :])
        b_all = b_all.at[sl].set((conv_b[i] - mean[sl]) * s_blk + beta[sl])
    return w_all, b_all


# ----------------------------------------------------------------------------
# Pallas kernel
# ----------------------------------------------------------------------------
def _pad_seq(v, pad_l, pad_r):
    """Zero-pad along axis 1 (sequence) in registers (no HBM pad, no scratch)."""
    parts = []
    if pad_l:
        parts.append(jnp.zeros(v.shape[:1] + (pad_l,) + v.shape[2:], v.dtype))
    parts.append(v)
    if pad_r:
        parts.append(jnp.zeros(v.shape[:1] + (pad_r,) + v.shape[2:], v.dtype))
    return jnp.concatenate(parts, axis=1) if len(parts) > 1 else v


def _make_kernel(*, TB, L, D, H, C1, max_k, pad_l, pad_r, output_act):
    M = TB * L

    def act(v):
        if output_act == "tanh":
            return jnp.tanh(v)
        if output_act == "sigmoid":
            return jax.nn.sigmoid(v)
        return v

    def kernel(x_ref, w1m_ref, b1m_ref, w2m_ref, b2m_ref,
               wc1_ref, bc1_ref, wc2_ref, bc2_ref,
               wfc1_ref, bfc1_ref, wfc2_ref, bfc2_ref, out_ref):
        # x_ref : (TB, L, D)    out_ref : (TB, L, 8)
        x = x_ref[...]
        x2 = x.reshape(M, D)

        # ---- 6 plain MoBYMLP decoders fused: one wide matmul + block-diag head ----
        h = jnp.dot(x2, w1m_ref[...], preferred_element_type=jnp.float32)
        h = jnp.maximum(h + b1m_ref[...], 0.0)                              # (M, 6H)
        mlp_o = jnp.dot(h, w2m_ref[...],
                        preferred_element_type=jnp.float32) + b2m_ref[...]  # (M, 6)

        # ---- 2 MultiScaleCNN decoders fused ----
        # conv bank 1 ('same', BN folded): im2col slab, single matmul K = max_k*D.
        xp = _pad_seq(x, pad_l, pad_r)                                      # (TB, L_pad, D)
        slab1 = jnp.concatenate([xp[:, t:t + L, :] for t in range(max_k)],
                                axis=-1).reshape(M, max_k * D)
        c1 = jnp.dot(slab1, wc1_ref[...], preferred_element_type=jnp.float32)
        c1 = jnp.maximum(c1 + bc1_ref[...], 0.0)                            # (M, 2*C1)

        # conv bank 2 (block-diagonal weights keep both decoders fused).
        c1p = _pad_seq(c1.reshape(TB, L, 2 * C1), pad_l, pad_r)             # (TB, L_pad, 2*C1)
        slab2 = jnp.concatenate([c1p[:, t:t + L, :] for t in range(max_k)],
                                axis=-1).reshape(M, max_k * 2 * C1)
        c2 = jnp.dot(slab2, wc2_ref[...], preferred_element_type=jnp.float32)
        c2 = jnp.maximum(c2 + bc2_ref[...], 0.0)                            # (M, 2*C1)

        # fc_multiclass MoBYMLP head (BN folded, block-diagonal across the 2 decoders).
        hf = jnp.dot(c2, wfc1_ref[...], preferred_element_type=jnp.float32)
        hf = jnp.maximum(hf + bfc1_ref[...], 0.0)                           # (M, 2H)
        cnn_o = jnp.dot(hf, wfc2_ref[...],
                        preferred_element_type=jnp.float32) + bfc2_ref[...] # (M, 2)

        # ---- assemble all 8 channels, single lane-dense store ----
        out8 = jnp.concatenate([mlp_o[:, 0:4], cnn_o, mlp_o[:, 4:6]], axis=-1)  # (M, 8)
        out_ref[...] = act(out8).reshape(TB, L, _NUM_DECODERS).astype(out_ref.dtype)

    return kernel


# ----------------------------------------------------------------------------
# Wrapper
# ----------------------------------------------------------------------------
def parallel_decoders_forward(x, params, kernel_sizes, *, inner_dim,
                              out_channels=8, output_act=None, batch_tile=None,
                              eps=_BN_EPS):
    """x: (B, L, D) float32.  Returns (B, 8, L), matching the PyTorch module."""
    B, L, D = x.shape
    n_k = len(kernel_sizes)
    C1 = out_channels * n_k
    H = inner_dim
    max_k = max(kernel_sizes)
    pad_l = (max_k - 1) // 2
    pad_r = max_k // 2

    # ---- one-time glue: fold BN, stack / block-diagonalize per-decoder parameters ----
    folds = [_fold_mlp(p, eps) for p in params["mlp"]]          # order: channels 0-3, 6, 7
    w1m = jnp.concatenate([f[0] for f in folds], axis=1)        # (D, 6H)
    b1m = jnp.concatenate([f[1] for f in folds]).reshape(1, 6 * H)
    w2m = jnp.zeros((6 * H, 6), jnp.float32)
    for j, f in enumerate(folds):
        w2m = w2m.at[j * H:(j + 1) * H, j].set(f[2])            # block-diag head
    b2m = jnp.stack([f[3] for f in folds]).reshape(1, 6)

    c_folds = []
    for p in params["cnn"]:
        w1a, b1a = _fold_conv_block(p["conv1_w"], p["conv1_b"],
                                    p["bn1_gamma"], p["bn1_beta"],
                                    p["bn1_mean"], p["bn1_var"],
                                    kernel_sizes, out_channels, D, max_k, eps)
        w2a, b2a = _fold_conv_block(p["conv2_w"], p["conv2_b"],
                                    p["bn2_gamma"], p["bn2_beta"],
                                    p["bn2_mean"], p["bn2_var"],
                                    kernel_sizes, out_channels, C1, max_k, eps)
        c_folds.append((w1a, b1a, w2a, b2a, _fold_mlp(p["fc"], eps)))

    # conv1: both decoders share x -> stack along output dim, im2col reshape.
    wc1 = jnp.concatenate([cf[0] for cf in c_folds], axis=2)    # (max_k, D, 2*C1)
    wc1 = wc1.reshape(max_k * D, 2 * C1)
    bc1 = jnp.concatenate([cf[1] for cf in c_folds]).reshape(1, 2 * C1)

    # conv2: block-diagonal per tap, then im2col reshape.
    wc2 = jnp.zeros((max_k, 2 * C1, 2 * C1), jnp.float32)
    wc2 = wc2.at[:, :C1, :C1].set(c_folds[0][2])
    wc2 = wc2.at[:, C1:, C1:].set(c_folds[1][2])
    wc2 = wc2.reshape(max_k * 2 * C1, 2 * C1)
    bc2 = jnp.concatenate([cf[3] for cf in c_folds]).reshape(1, 2 * C1)

    # fc head: block-diagonal hidden layer + block-diagonal 1-wide heads.
    wfc1 = jnp.zeros((2 * C1, 2 * H), jnp.float32)
    wfc1 = wfc1.at[:C1, :H].set(c_folds[0][4][0])
    wfc1 = wfc1.at[C1:, H:].set(c_folds[1][4][0])
    bfc1 = jnp.concatenate([c_folds[0][4][1], c_folds[1][4][1]]).reshape(1, 2 * H)
    wfc2 = jnp.zeros((2 * H, 2), jnp.float32)
    wfc2 = wfc2.at[:H, 0].set(c_folds[0][4][2])
    wfc2 = wfc2.at[H:, 1].set(c_folds[1][4][2])
    bfc2 = jnp.stack([c_folds[0][4][3], c_folds[1][4][3]]).reshape(1, 2)

    # ---- batch tiling: several sequences per grid step fill the MXU M dimension ----
    if batch_tile is None:
        batch_tile = max(1, min(B, max(1, 256 // max(L, 1))))
    TB = batch_tile
    B_pad = -(-B // TB) * TB
    x32 = x.astype(jnp.float32)
    if B_pad != B:
        x32 = jnp.concatenate(
            [x32, jnp.zeros((B_pad - B, L, D), jnp.float32)], axis=0)

    kernel = _make_kernel(TB=TB, L=L, D=D, H=H, C1=C1, max_k=max_k,
                          pad_l=pad_l, pad_r=pad_r, output_act=output_act)

    def const2(arr):   # full-array, VMEM-resident weights (constant index map)
        return pl.BlockSpec(arr.shape, lambda b: (0, 0))

    out_l8 = pl.pallas_call(
        kernel,
        out_shape=jax.ShapeDtypeStruct((B_pad, L, _NUM_DECODERS), jnp.float32),
        grid=(B_pad // TB,),
        in_specs=[
            pl.BlockSpec((TB, L, D), lambda b: (b, 0, 0)),   # streamed per batch tile
            const2(w1m), const2(b1m), const2(w2m), const2(b2m),
            const2(wc1), const2(bc1), const2(wc2), const2(bc2),
            const2(wfc1), const2(bfc1), const2(wfc2), const2(bfc2),
        ],
        out_specs=pl.BlockSpec((TB, L, _NUM_DECODERS), lambda b: (b, 0, 0)),
        compiler_params=pltpu.CompilerParams(
            dimension_semantics=("parallel",),       # batch tiles -> both TCs on v7x
            vmem_limit_bytes=32 * 1024 * 1024,
        ),
    )(x32, w1m, b1m, w2m, b2m, wc1, bc1, wc2, bc2, wfc1, bfc1, wfc2, bfc2)

    # Module output layout is (B, num_decoders, L); tiny transpose done in glue.
    return jnp.transpose(out_l8[:B], (0, 2, 1))


# ----------------------------------------------------------------------------
# Pure-JAX reference (eval-mode PyTorch semantics, unfolded BN)
# ----------------------------------------------------------------------------
def _reference(x, params, kernel_sizes, out_channels, output_act=None, eps=_BN_EPS):
    B, L, D = x.shape
    P = jax.lax.Precision.HIGHEST

    def mlp(x2d, p):
        z = jnp.dot(x2d, p["w1"].T, precision=P) + p["b1"]
        z = (z - p["bn_mean"]) / jnp.sqrt(p["bn_var"] + eps) * p["bn_gamma"] + p["bn_beta"]
        h = jnp.maximum(z, 0.0)
        return jnp.dot(h, p["w2"].T, precision=P) + p["b2"]             # (N, 1)

    def conv1d_same(xcl, w, b):     # xcl (B, Cin, L), w (OC, Cin, k), b (OC,)
        k = w.shape[-1]
        left, right = (k - 1) // 2, k // 2
        xpd = jnp.pad(xcl, ((0, 0), (0, 0), (left, right)))
        y = jnp.zeros((xcl.shape[0], w.shape[0], L), jnp.float32)
        for t in range(k):
            y = y + jnp.einsum("bcl,oc->bol", xpd[:, :, t:t + L], w[:, :, t], precision=P)
        return y + b[None, :, None]

    def bn_c(xcl, gamma, beta, mean, var):
        inv = gamma / jnp.sqrt(var + eps)
        return (xcl - mean[None, :, None]) * inv[None, :, None] + beta[None, :, None]

    outs = []
    mlp_iter = iter(params["mlp"])
    for d in range(_NUM_DECODERS):
        if d in _CNN_CHANNELS:
            p = params["cnn"][d - 4]
            xc = jnp.transpose(x, (0, 2, 1))                            # (B, D, L)
            c1 = jnp.concatenate([conv1d_same(xc, w, b)
                                  for w, b in zip(p["conv1_w"], p["conv1_b"])], axis=1)
            c1 = jnp.maximum(bn_c(c1, p["bn1_gamma"], p["bn1_beta"],
                                  p["bn1_mean"], p["bn1_var"]), 0.0)
            c2 = jnp.concatenate([conv1d_same(c1, w, b)
                                  for w, b in zip(p["conv2_w"], p["conv2_b"])], axis=1)
            c2 = jnp.maximum(bn_c(c2, p["bn2_gamma"], p["bn2_beta"],
                                  p["bn2_mean"], p["bn2_var"]), 0.0)
            feat = jnp.transpose(c2, (0, 2, 1)).reshape(-1, c2.shape[1])
            o = mlp(feat, p["fc"]).reshape(B, L)
        else:
            p = next(mlp_iter)
            o = mlp(x.reshape(-1, D), p).reshape(B, L)
        if output_act == "tanh":
            o = jnp.tanh(o)
        elif output_act == "sigmoid":
            o = jax.nn.sigmoid(o)
        outs.append(o)
    return jnp.stack(outs, axis=1)                                      # (B, 8, L)


# ----------------------------------------------------------------------------
# Deterministic parameter init (PyTorch layouts)
# ----------------------------------------------------------------------------
def _rand(key, shape, scale=0.1):
    return scale * jax.random.normal(key, shape, dtype=jnp.float32)


def init_params(key, D, H, out_channels, kernel_sizes):
    n_k = len(kernel_sizes)
    C1 = out_channels * n_k
    it = iter(list(jax.random.split(key, 256)))

    def mlp_params(din):
        return dict(
            w1=_rand(next(it), (H, din)),
            b1=_rand(next(it), (H,)),
            bn_gamma=1.0 + _rand(next(it), (H,)),
            bn_beta=_rand(next(it), (H,)),
            bn_mean=_rand(next(it), (H,)),
            bn_var=jnp.abs(jax.random.normal(next(it), (H,), dtype=jnp.float32)) + 0.5,
            w2=_rand(next(it), (1, H)),
            b2=_rand(next(it), (1,)),
        )

    def cnn_params():
        return dict(
            conv1_w=[_rand(next(it), (out_channels, D, k)) for k in kernel_sizes],
            conv1_b=[_rand(next(it), (out_channels,)) for _ in kernel_sizes],
            bn1_gamma=1.0 + _rand(next(it), (C1,)),
            bn1_beta=_rand(next(it), (C1,)),
            bn1_mean=_rand(next(it), (C1,)),
            bn1_var=jnp.abs(jax.random.normal(next(it), (C1,), dtype=jnp.float32)) + 0.5,
            conv2_w=[_rand(next(it), (out_channels, C1, k)) for k in kernel_sizes],
            conv2_b=[_rand(next(it), (out_channels,)) for _ in kernel_sizes],
            bn2_gamma=1.0 + _rand(next(it), (C1,)),
            bn2_beta=_rand(next(it), (C1,)),
            bn2_mean=_rand(next(it), (C1,)),
            bn2_var=jnp.abs(jax.random.normal(next(it), (C1,), dtype=jnp.float32)) + 0.5,
            fc=mlp_params(C1),
        )

    return dict(mlp=[mlp_params(D) for _ in range(6)],
                cnn=[cnn_params() for _ in range(2)])


if __name__ == "__main__":
    B, L, D = 2, 16, 32           # batch, sequence, input_size
    H = 32                        # inner_linear_dim
    OC = 8                        # out_channels (module default)
    KERNEL_SIZES = (3, 5)         # multiscale conv kernel sizes

    key = jax.random.PRNGKey(0)
    k_x, k_p = jax.random.split(key)
    x = jax.random.normal(k_x, (B, L, D), dtype=jnp.float32)
    params = init_params(k_p, D, H, OC, KERNEL_SIZES)

    out = parallel_decoders_forward(x, params, KERNEL_SIZES, inner_dim=H,
                                    out_channels=OC, output_act=None)
    out = jax.block_until_ready(out)

    ref = _reference(x, params, KERNEL_SIZES, OC, output_act=None)
    assert out.shape == (B, _NUM_DECODERS, L), out.shape
    max_err = float(jnp.max(jnp.abs(out - ref)))
    assert jnp.allclose(out, ref, atol=1e-3, rtol=1e-3), max_err

    print("KERNEL_OK")
</pallas_src>

<mosaic_0001>
module attributes {stable_mosaic.version = 11 : i64} {
  func.func @kernel(%arg0: i32, %arg1: memref<2x16x32xf32, #tpu.memory_space<vmem>>, %arg2: memref<32x192xf32, #tpu.memory_space<vmem>>, %arg3: memref<1x192xf32, #tpu.memory_space<vmem>>, %arg4: memref<192x6xf32, #tpu.memory_space<vmem>>, %arg5: memref<1x6xf32, #tpu.memory_space<vmem>>, %arg6: memref<160x32xf32, #tpu.memory_space<vmem>>, %arg7: memref<1x32xf32, #tpu.memory_space<vmem>>, %arg8: memref<160x32xf32, #tpu.memory_space<vmem>>, %arg9: memref<1x32xf32, #tpu.memory_space<vmem>>, %arg10: memref<32x64xf32, #tpu.memory_space<vmem>>, %arg11: memref<1x64xf32, #tpu.memory_space<vmem>>, %arg12: memref<64x2xf32, #tpu.memory_space<vmem>>, %arg13: memref<1x2xf32, #tpu.memory_space<vmem>>, %arg14: memref<2x16x8xf32, #tpu.memory_space<vmem>>) attributes {dimension_semantics = [#tpu.dimension_semantics<parallel>], iteration_bounds = array<i64: 1>, scalar_prefetch = 0 : i64, scratch_operands = 0 : i64, tpu.core_type = #tpu.core_type<tc>, window_params = [{transform_indices = @transform_0, window_bounds = array<i64: 2, 16, 32>}, {pipeline_mode = #tpu.pipeline_mode<synchronous>, transform_indices = @transform_1, window_bounds = array<i64: 32, 192>}, {pipeline_mode = #tpu.pipeline_mode<synchronous>, transform_indices = @transform_2, window_bounds = array<i64: 1, 192>}, {pipeline_mode = #tpu.pipeline_mode<synchronous>, transform_indices = @transform_3, window_bounds = array<i64: 192, 6>}, {pipeline_mode = #tpu.pipeline_mode<synchronous>, transform_indices = @transform_4, window_bounds = array<i64: 1, 6>}, {pipeline_mode = #tpu.pipeline_mode<synchronous>, transform_indices = @transform_5, window_bounds = array<i64: 160, 32>}, {pipeline_mode = #tpu.pipeline_mode<synchronous>, transform_indices = @transform_6, window_bounds = array<i64: 1, 32>}, {pipeline_mode = #tpu.pipeline_mode<synchronous>, transform_indices = @transform_7, window_bounds = array<i64: 160, 32>}, {pipeline_mode = #tpu.pipeline_mode<synchronous>, transform_indices = @transform_8, window_bounds = array<i64: 1, 32>}, {pipeline_mode = #tpu.pipeline_mode<synchronous>, transform_indices = @transform_9, window_bounds = array<i64: 32, 64>}, {pipeline_mode = #tpu.pipeline_mode<synchronous>, transform_indices = @transform_10, window_bounds = array<i64: 1, 64>}, {pipeline_mode = #tpu.pipeline_mode<synchronous>, transform_indices = @transform_11, window_bounds = array<i64: 64, 2>}, {pipeline_mode = #tpu.pipeline_mode<synchronous>, transform_indices = @transform_12, window_bounds = array<i64: 1, 2>}, {transform_indices = @transform_13, window_bounds = array<i64: 2, 16, 8>}]} {
    %c0 = arith.constant 0 : index
    %c0_0 = arith.constant 0 : index
    %c0_1 = arith.constant 0 : index
    %0 = vector.load %arg1[%c0, %c0_0, %c0_1] : memref<2x16x32xf32, #tpu.memory_space<vmem>>, vector<2x16x32xf32>
    %1 = vector.shape_cast %0 : vector<2x16x32xf32> to vector<32x32xf32>
    %c0_2 = arith.constant 0 : index
    %c0_3 = arith.constant 0 : index
    %2 = vector.load %arg2[%c0_2, %c0_3] : memref<32x192xf32, #tpu.memory_space<vmem>>, vector<32x192xf32>
    %cst = arith.constant dense<0.000000e+00> : vector<32x192xf32>
    %3 = tpu.matmul %1, %2, %cst {dimension_numbers = #tpu.dot_dimension_numbers<[1], [0], [0], [1], [0, 0, 1, 1], [], []>} : vector<32x32xf32>, vector<32x192xf32>, vector<32x192xf32> -> vector<32x192xf32>
    %c0_4 = arith.constant 0 : index
    %c0_5 = arith.constant 0 : index
    %4 = vector.load %arg3[%c0_4, %c0_5] : memref<1x192xf32, #tpu.memory_space<vmem>>, vector<1x192xf32>
    %5 = vector.broadcast %4 : vector<1x192xf32> to vector<32x192xf32>
    %6 = arith.addf %3, %5 : vector<32x192xf32>
    %cst_6 = arith.constant 0.000000e+00 : f32
    %7 = vector.broadcast %cst_6 : f32 to vector<32x192xf32>
    %8 = arith.maximumf %6, %7 : vector<32x192xf32>
    %c0_7 = arith.constant 0 : index
    %c0_8 = arith.constant 0 : index
    %9 = vector.load %arg4[%c0_7, %c0_8] : memref<192x6xf32, #tpu.memory_space<vmem>>, vector<192x6xf32>
    %cst_9 = arith.constant dense<0.000000e+00> : vector<32x6xf32>
    %10 = tpu.matmul %8, %9, %cst_9 {dimension_numbers = #tpu.dot_dimension_numbers<[1], [0], [0], [1], [0, 0, 1, 1], [], []>} : vector<32x192xf32>, vector<192x6xf32>, vector<32x6xf32> -> vector<32x6xf32>
    %c0_10 = arith.constant 0 : index
    %c0_11 = arith.constant 0 : index
    %11 = vector.load %arg5[%c0_10, %c0_11] : memref<1x6xf32, #tpu.memory_space<vmem>>, vector<1x6xf32>
    %12 = vector.broadcast %11 : vector<1x6xf32> to vector<32x6xf32>
    %13 = arith.addf %10, %12 : vector<32x6xf32>
    %cst_12 = arith.constant 0.000000e+00 : f32
    %14 = vector.broadcast %cst_12 : f32 to vector<2x2x32xf32>
    %cst_13 = arith.constant 0.000000e+00 : f32
    %15 = vector.broadcast %cst_13 : f32 to vector<2x2x32xf32>
    %16 = tpu.concatenate %14, %0, %15 in 1 : vector<2x2x32xf32>, vector<2x16x32xf32>, vector<2x2x32xf32> -> vector<2x20x32xf32>
    %17 = vector.extract_strided_slice %16 {offsets = [0, 0, 0], sizes = [2, 16, 32], strides = [1, 1, 1]} : vector<2x20x32xf32> to vector<2x16x32xf32>
    %18 = vector.extract_strided_slice %16 {offsets = [0, 1, 0], sizes = [2, 16, 32], strides = [1, 1, 1]} : vector<2x20x32xf32> to vector<2x16x32xf32>
    %19 = vector.extract_strided_slice %16 {offsets = [0, 2, 0], sizes = [2, 16, 32], strides = [1, 1, 1]} : vector<2x20x32xf32> to vector<2x16x32xf32>
    %20 = vector.extract_strided_slice %16 {offsets = [0, 3, 0], sizes = [2, 16, 32], strides = [1, 1, 1]} : vector<2x20x32xf32> to vector<2x16x32xf32>
    %21 = vector.extract_strided_slice %16 {offsets = [0, 4, 0], sizes = [2, 16, 32], strides = [1, 1, 1]} : vector<2x20x32xf32> to vector<2x16x32xf32>
    %22 = tpu.concatenate %17, %18, %19, %20, %21 in 2 : vector<2x16x32xf32>, vector<2x16x32xf32>, vector<2x16x32xf32>, vector<2x16x32xf32>, vector<2x16x32xf32> -> vector<2x16x160xf32>
    %23 = vector.shape_cast %22 : vector<2x16x160xf32> to vector<32x160xf32>
    %c0_14 = arith.constant 0 : index
    %c0_15 = arith.constant 0 : index
    %24 = vector.load %arg6[%c0_14, %c0_15] : memref<160x32xf32, #tpu.memory_space<vmem>>, vector<160x32xf32>
    %cst_16 = arith.constant dense<0.000000e+00> : vector<32x32xf32>
    %25 = tpu.matmul %23, %24, %cst_16 {dimension_numbers = #tpu.dot_dimension_numbers<[1], [0], [0], [1], [0, 0, 1, 1], [], []>} : vector<32x160xf32>, vector<160x32xf32>, vector<32x32xf32> -> vector<32x32xf32>
    %c0_17 = arith.constant 0 : index
    %c0_18 = arith.constant 0 : index
    %26 = vector.load %arg7[%c0_17, %c0_18] : memref<1x32xf32, #tpu.memory_space<vmem>>, vector<1x32xf32>
    %27 = vector.broadcast %26 : vector<1x32xf32> to vector<32x32xf32>
    %28 = arith.addf %25, %27 : vector<32x32xf32>
    %cst_19 = arith.constant 0.000000e+00 : f32
    %29 = vector.broadcast %cst_19 : f32 to vector<32x32xf32>
    %30 = arith.maximumf %28, %29 : vector<32x32xf32>
    %31 = vector.shape_cast %30 : vector<32x32xf32> to vector<2x16x32xf32>
    %cst_20 = arith.constant 0.000000e+00 : f32
    %32 = vector.broadcast %cst_20 : f32 to vector<2x2x32xf32>
    %cst_21 = arith.constant 0.000000e+00 : f32
    %33 = vector.broadcast %cst_21 : f32 to vector<2x2x32xf32>
    %34 = tpu.concatenate %32, %31, %33 in 1 : vector<2x2x32xf32>, vector<2x16x32xf32>, vector<2x2x32xf32> -> vector<2x20x32xf32>
    %35 = vector.extract_strided_slice %34 {offsets = [0, 0, 0], sizes = [2, 16, 32], strides = [1, 1, 1]} : vector<2x20x32xf32> to vector<2x16x32xf32>
    %36 = vector.extract_strided_slice %34 {offsets = [0, 1, 0], sizes = [2, 16, 32], strides = [1, 1, 1]} : vector<2x20x32xf32> to vector<2x16x32xf32>
    %37 = vector.extract_strided_slice %34 {offsets = [0, 2, 0], sizes = [2, 16, 32], strides = [1, 1, 1]} : vector<2x20x32xf32> to vector<2x16x32xf32>
    %38 = vector.extract_strided_slice %34 {offsets = [0, 3, 0], sizes = [2, 16, 32], strides = [1, 1, 1]} : vector<2x20x32xf32> to vector<2x16x32xf32>
    %39 = vector.extract_strided_slice %34 {offsets = [0, 4, 0], sizes = [2, 16, 32], strides = [1, 1, 1]} : vector<2x20x32xf32> to vector<2x16x32xf32>
    %40 = tpu.concatenate %35, %36, %37, %38, %39 in 2 : vector<2x16x32xf32>, vector<2x16x32xf32>, vector<2x16x32xf32>, vector<2x16x32xf32>, vector<2x16x32xf32> -> vector<2x16x160xf32>
    %41 = vector.shape_cast %40 : vector<2x16x160xf32> to vector<32x160xf32>
    %c0_22 = arith.constant 0 : index
    %c0_23 = arith.constant 0 : index
    %42 = vector.load %arg8[%c0_22, %c0_23] : memref<160x32xf32, #tpu.memory_space<vmem>>, vector<160x32xf32>
    %cst_24 = arith.constant dense<0.000000e+00> : vector<32x32xf32>
    %43 = tpu.matmul %41, %42, %cst_24 {dimension_numbers = #tpu.dot_dimension_numbers<[1], [0], [0], [1], [0, 0, 1, 1], [], []>} : vector<32x160xf32>, vector<160x32xf32>, vector<32x32xf32> -> vector<32x32xf32>
    %c0_25 = arith.constant 0 : index
    %c0_26 = arith.constant 0 : index
    %44 = vector.load %arg9[%c0_25, %c0_26] : memref<1x32xf32, #tpu.memory_space<vmem>>, vector<1x32xf32>
    %45 = vector.broadcast %44 : vector<1x32xf32> to vector<32x32xf32>
    %46 = arith.addf %43, %45 : vector<32x32xf32>
    %cst_27 = arith.constant 0.000000e+00 : f32
    %47 = vector.broadcast %cst_27 : f32 to vector<32x32xf32>
    %48 = arith.maximumf %46, %47 : vector<32x32xf32>
    %c0_28 = arith.constant 0 : index
    %c0_29 = arith.constant 0 : index
    %49 = vector.load %arg10[%c0_28, %c0_29] : memref<32x64xf32, #tpu.memory_space<vmem>>, vector<32x64xf32>
    %cst_30 = arith.constant dense<0.000000e+00> : vector<32x64xf32>
    %50 = tpu.matmul %48, %49, %cst_30 {dimension_numbers = #tpu.dot_dimension_numbers<[1], [0], [0], [1], [0, 0, 1, 1], [], []>} : vector<32x32xf32>, vector<32x64xf32>, vector<32x64xf32> -> vector<32x64xf32>
    %c0_31 = arith.constant 0 : index
    %c0_32 = arith.constant 0 : index
    %51 = vector.load %arg11[%c0_31, %c0_32] : memref<1x64xf32, #tpu.memory_space<vmem>>, vector<1x64xf32>
    %52 = vector.broadcast %51 : vector<1x64xf32> to vector<32x64xf32>
    %53 = arith.addf %50, %52 : vector<32x64xf32>
    %cst_33 = arith.constant 0.000000e+00 : f32
    %54 = vector.broadcast %cst_33 : f32 to vector<32x64xf32>
    %55 = arith.maximumf %53, %54 : vector<32x64xf32>
    %c0_34 = arith.constant 0 : index
    %c0_35 = arith.constant 0 : index
    %56 = vector.load %arg12[%c0_34, %c0_35] : memref<64x2xf32, #tpu.memory_space<vmem>>, vector<64x2xf32>
    %cst_36 = arith.constant dense<0.000000e+00> : vector<32x2xf32>
    %57 = tpu.matmul %55, %56, %cst_36 {dimension_numbers = #tpu.dot_dimension_numbers<[1], [0], [0], [1], [0, 0, 1, 1], [], []>} : vector<32x64xf32>, vector<64x2xf32>, vector<32x2xf32> -> vector<32x2xf32>
    %c0_37 = arith.constant 0 : index
    %c0_38 = arith.constant 0 : index
    %58 = vector.load %arg13[%c0_37, %c0_38] : memref<1x2xf32, #tpu.memory_space<vmem>>, vector<1x2xf32>
    %59 = vector.broadcast %58 : vector<1x2xf32> to vector<32x2xf32>
    %60 = arith.addf %57, %59 : vector<32x2xf32>
    %61 = vector.extract_strided_slice %13 {offsets = [0, 0], sizes = [32, 4], strides = [1, 1]} : vector<32x6xf32> to vector<32x4xf32>
    %62 = vector.extract_strided_slice %13 {offsets = [0, 4], sizes = [32, 2], strides = [1, 1]} : vector<32x6xf32> to vector<32x2xf32>
    %63 = tpu.concatenate %61, %60, %62 in 1 : vector<32x4xf32>, vector<32x2xf32>, vector<32x2xf32> -> vector<32x8xf32>
    %64 = vector.shape_cast %63 : vector<32x8xf32> to vector<2x16x8xf32>
    %c0_39 = arith.constant 0 : index
    %c0_40 = arith.constant 0 : index
    %c0_41 = arith.constant 0 : index
    %65 = vector.load %arg14[%c0_39, %c0_40, %c0_41] : memref<2x16x8xf32, #tpu.memory_space<vmem>>, vector<2x16x8xf32>
    tpu.vector_store %arg14[%c0_39, %c0_40, %c0_41], %64 {strides = array<i32>} : memref<2x16x8xf32, #tpu.memory_space<vmem>>, vector<2x16x8xf32>,
    return
  }
  func.func @transform_0(%arg0: i32) -> (i32, i32, i32) {
    %c0_i32 = arith.constant 0 : i32
    %c0_i32_0 = arith.constant 0 : i32
    %c0_i32_1 = arith.constant 0 : i32
    return %arg0, %c0_i32, %c0_i32_0 : i32, i32, i32
  }
  func.func @transform_1(%arg0: i32) -> (i32, i32) {
    %c0_i32 = arith.constant 0 : i32
    %c0_i32_0 = arith.constant 0 : i32
    %c0_i32_1 = arith.constant 0 : i32
    return %c0_i32, %c0_i32_0 : i32, i32
  }
  func.func @transform_2(%arg0: i32) -> (i32, i32) {
    %c0_i32 = arith.constant 0 : i32
    %c0_i32_0 = arith.constant 0 : i32
    %c0_i32_1 = arith.constant 0 : i32
    return %c0_i32, %c0_i32_0 : i32, i32
  }
  func.func @transform_3(%arg0: i32) -> (i32, i32) {
    %c0_i32 = arith.constant 0 : i32
    %c0_i32_0 = arith.constant 0 : i32
    %c0_i32_1 = arith.constant 0 : i32
    return %c0_i32, %c0_i32_0 : i32, i32
  }
  func.func @transform_4(%arg0: i32) -> (i32, i32) {
    %c0_i32 = arith.constant 0 : i32
    %c0_i32_0 = arith.constant 0 : i32
    %c0_i32_1 = arith.constant 0 : i32
    return %c0_i32, %c0_i32_0 : i32, i32
  }
  func.func @transform_5(%arg0: i32) -> (i32, i32) {
    %c0_i32 = arith.constant 0 : i32
    %c0_i32_0 = arith.constant 0 : i32
    %c0_i32_1 = arith.constant 0 : i32
    return %c0_i32, %c0_i32_0 : i32, i32
  }
  func.func @transform_6(%arg0: i32) -> (i32, i32) {
    %c0_i32 = arith.constant 0 : i32
    %c0_i32_0 = arith.constant 0 : i32
    %c0_i32_1 = arith.constant 0 : i32
    return %c0_i32, %c0_i32_0 : i32, i32
  }
  func.func @transform_7(%arg0: i32) -> (i32, i32) {
    %c0_i32 = arith.constant 0 : i32
    %c0_i32_0 = arith.constant 0 : i32
    %c0_i32_1 = arith.constant 0 : i32
    return %c0_i32, %c0_i32_0 : i32, i32
  }
  func.func @transform_8(%arg0: i32) -> (i32, i32) {
    %c0_i32 = arith.constant 0 : i32
    %c0_i32_0 = arith.constant 0 : i32
    %c0_i32_1 = arith.constant 0 : i32
    return %c0_i32, %c0_i32_0 : i32, i32
  }
  func.func @transform_9(%arg0: i32) -> (i32, i32) {
    %c0_i32 = arith.constant 0 : i32
    %c0_i32_0 = arith.constant 0 : i32
    %c0_i32_1 = arith.constant 0 : i32
    return %c0_i32, %c0_i32_0 : i32, i32
  }
  func.func @transform_10(%arg0: i32) -> (i32, i32) {
    %c0_i32 = arith.constant 0 : i32
    %c0_i32_0 = arith.constant 0 : i32
    %c0_i32_1 = arith.constant 0 : i32
    return %c0_i32, %c0_i32_0 : i32, i32
  }
  func.func @transform_11(%arg0: i32) -> (i32, i32) {
    %c0_i32 = arith.constant 0 : i32
    %c0_i32_0 = arith.constant 0 : i32
    %c0_i32_1 = arith.constant 0 : i32
    return %c0_i32, %c0_i32_0 : i32, i32
  }
  func.func @transform_12(%arg0: i32) -> (i32, i32) {
    %c0_i32 = arith.constant 0 : i32
    %c0_i32_0 = arith.constant 0 : i32
    %c0_i32_1 = arith.constant 0 : i32
    return %c0_i32, %c0_i32_0 : i32, i32
  }
  func.func @transform_13(%arg0: i32) -> (i32, i32, i32) {
    %c0_i32 = arith.constant 0 : i32
    %c0_i32_0 = arith.constant 0 : i32
    %c0_i32_1 = arith.constant 0 : i32
    return %arg0, %c0_i32, %c0_i32_0 : i32, i32, i32
  }
}

</mosaic_0001>

<bundles_post_ra>
// kernel: tpu_custom_call.1
= control target key start
LH: loop header
LB: loop body
LE: loop exit
PB: predicated region body
PF: predicated region fallthrough
CT: control target
= control target key end

     0   :  { %vm307_vm0 = vcmask 1041408   ;;  %v1177_v7 = vmov 0.0   ;;  %vm328_vm1 = vcmask 1046528   ;;  %vm351_vm2 = vcmask 1045504   ;;  %s1178_s25 = smov 32   ;;  %s1179_s28 = smov 96   ;;  %s1847_s0 = inlined_call_operand.vmem [shape: f32[2,16,32], index: 0, kind: input, shape index: {}]   ;;  %s1848_s5 = inlined_call_operand.vmem [shape: f32[160,32], index: 5, kind: input, shape index: {}]   ;;  %s1849_s7 = inlined_call_operand.vmem [shape: f32[160,32], index: 7, kind: input, shape index: {}]   ;;  %s1850_s1 = inlined_call_operand.vmem [shape: f32[32,192], index: 1, kind: input, shape index: {}]   ;;  %s1851_s6 = inlined_call_operand.vmem [shape: f32[1,32], index: 6, kind: input, shape index: {}]   ;;  %s1852_s3 = inlined_call_operand.vmem [shape: f32[192,6], index: 3, kind: input, shape index: {}]   ;;  %s1853_s9 = inlined_call_operand.vmem [shape: f32[32,64], index: 9, kind: input, shape index: {}]   ;;  %s1854_s2 = inlined_call_operand.vmem [shape: f32[1,192], index: 2, kind: input, shape index: {}]   ;;  %s1855_s11 = inlined_call_operand.vmem [shape: f32[64,2], index: 11, kind: input, shape index: {}]   ;;  %s1856_s4 = inlined_call_operand.vmem [shape: f32[1,6], index: 4, kind: input, shape index: {}]   ;;  %s1857_s8 = inlined_call_operand.vmem [shape: f32[1,32], index: 8, kind: input, shape index: {}]   ;;  %s1858_s10 = inlined_call_operand.vmem [shape: f32[1,64], index: 10, kind: input, shape index: {}]   ;;  %s1859_s12 = inlined_call_operand.vmem [shape: f32[1,2], index: 12, kind: input, shape index: {}]   ;;  %s1860_s13 = inlined_call_operand.vmem [shape: f32[2,16,8], index: 13, kind: output, shape index: {}]  }
   0x1   :  { %v1256_v0 = vld [vmem:[%s1847_s0] sm:$0xff]  ;;  %v1261_v1 = vld [vmem:[%s1847_s0 + $0x8] sm:$0xff]  ;;  %v1266_v2 = vld [vmem:[%s1847_s0 + $0x10] sm:$0xff]  ;;  %456 = vmatprep.subr.mxu0 %v1177_v7  ;;  %145 = vmatprep.mubr.f32.mxu1 %v1177_v7  ;;  %vm374_vm3 = vcmask 1044480   ;;  %vm397_vm4 = vcmask 1043456   ;;  %s1180_s14 = smov 64  }
   0x2   :  { %v308_v3 = vrot.slane %v1256_v0, 6  ;;  %v309_v4 = vrot.slane %v1261_v1, 6  ;;  %v1273_v5 = vld [vmem:[%s1847_s0 + $0x18] sm:$0xff]  ;;  %v311_v6 = vrot.slane %v1266_v2, 6  ;;  %v435_v9 = vld [vmem:[%s1848_s5 + $0x70] sm:$0xff]  ;;  %v434_v15 = vld [vmem:[%s1848_s5 + $0x68] sm:$0xff] }
   0x3   :  { %v436_v8 = vld [vmem:[%s1848_s5 + $0x78] sm:$0xff]  ;;  %v312_v10 = vrot.slane %v1273_v5, 6  ;;  %v433_v24 = vld [vmem:[%s1848_s5 + $0x60] sm:$0xff]  ;;  %v431_v39 = vld [vmem:[%s1848_s5 + $0x50] sm:$0xff]  ;;  %vm68_vm5 = vcmask 261120   ;;  %vm209_vm6 = vcmask 523264  }
   0x4   :  { %457 = vmatpush1.msra.mxu0 %v436_v8  ;;  %v1286_v11 = vsel %vm307_vm0, %v308_v3, %v309_v4  ;;  %v1289_v12 = vsel %vm307_vm0, 0.0, %v308_v3  ;;  %v322_v13 = vsel %vm307_vm0, %v309_v4, 0.0  ;;  %v1293_v14 = vsel %vm307_vm0, 0.0, %v311_v6  ;;  %v432_v33 = vld [vmem:[%s1848_s5 + $0x58] sm:$0xff]  ;;  %v430_v45 = vld [vmem:[%s1848_s5 + $0x48] sm:$0xff]  ;;  %v429_v50 = vld [vmem:[%s1848_s5 + $0x40] sm:$0xff] }
   0x5   :  { %458 = vmatprep.subr.mxu0 %v1177_v7  ;;  %v329_v16 = vrot.slane %v1289_v12, 1  ;;  %v330_v17 = vrot.slane %v1286_v11, 1  ;;  %v332_v18 = vrot.slane %v322_v13, 1  ;;  %v352_v19 = vrot.slane %v1289_v12, 2  ;;  %v428_v55 = vld [vmem:[%s1848_s5 + $0x38] sm:$0xff]  ;;  %v427_v58 = vld [vmem:[%s1848_s5 + $0x30] sm:$0xff] }
   0x6   :  { %459 = vmatpush1.msra.mxu0 %v435_v9  ;;  %v353_v20 = vrot.slane %v1286_v11, 2  ;;  %v355_v21 = vrot.slane %v322_v13, 2  ;;  %v375_v22 = vrot.slane %v1289_v12, 3  ;;  %v376_v23 = vrot.slane %v1286_v11, 3  ;;  %v426_v61 = vld [vmem:[%s1848_s5 + $0x28] sm:$0xff]  ;;  %v425_v63 = vld [vmem:[%s1848_s5 + $0x20] sm:$0xff] }
   0x7   :  { %460 = vmatprep.subr.mxu0 %v1177_v7  ;;  %v331_v25 = vsel %vm328_vm1, %v329_v16, %v330_v17  ;;  %v333_v26 = vsel %vm328_vm1, %v330_v17, %v332_v18  ;;  %v378_v27 = vrot.slane %v322_v13, 3  ;;  %v1312_v28 = vsel %vm307_vm0, %v311_v6, %v312_v10  ;;  %v424_v4 = vld [vmem:[%s1848_s5 + $0x18] sm:$0xff]  ;;  %v423_v6 = vld [vmem:[%s1848_s5 + $0x10] sm:$0xff]  ;;  %v422_v8 = vld [vmem:[%s1848_s5 + $0x8] sm:$0xff] }
   0x8   :  { %461 = vmatpush1.msra.mxu0 %v434_v15  ;;  %v1147_v29 = vpack.i.bf16 %v333_v26, %v331_v25  ;;  %v354_v30 = vsel %vm351_vm2, %v352_v19, %v353_v20  ;;  %v356_v31 = vsel %vm351_vm2, %v353_v20, %v355_v21  ;;  %v377_v32 = vsel %vm374_vm3, %v375_v22, %v376_v23  ;;  %v421_v9 = vld [vmem:[%s1848_s5] sm:$0xff]  ;;  %v438_v15 = vld [vmem:[%s1848_s5 + $0x88] sm:$0xff] }
   0x9   :  { %462 = vmatprep.subr.mxu0 %v1177_v7  ;;  %v379_v34 = vsel %vm374_vm3, %v376_v23, %v378_v27  ;;  %v334_v35 = vrot.slane %v1293_v14, 1  ;;  %v335_v36 = vrot.slane %v1312_v28, 1  ;;  %v1152_v37 = vpack.i.bf16 %v356_v31, %v354_v30  ;;  %v437_v16 = vld [vmem:[%s1848_s5 + $0x80] sm:$0xff] }
   0xa   :  { %463 = vmatpush1.msra.mxu0 %v433_v24  ;;  %1148 = vrot.lane.b32.xlu0 %v1147_v29, %s1178_s25  ;;  %v1157_v38 = vpack.i.bf16 %v379_v34, %v377_v32  ;;  %v357_v40 = vrot.slane %v1293_v14, 2  ;;  %v358_v41 = vrot.slane %v1312_v28, 2  ;;  %v398_v42 = vrot.slane %v1289_v12, 4 }
   0xb   :  { %464 = vmatprep.subr.mxu0 %v1177_v7  ;;  %v380_v43 = vrot.slane %v1293_v14, 3  ;;  %v1335_v44 = vsel %vm307_vm0, %v312_v10, 0.0  ;;  %v336_v46 = vsel %vm328_vm1, %v334_v35, %v335_v36  ;;  %v381_v47 = vrot.slane %v1312_v28, 3  ;;  %v440_v10 = vld [vmem:[%s1848_s5 + $0x98] sm:$0xff] }
   0xc   :  { %465 = vmatpush1.msra.mxu0 %v432_v33  ;;  %1158 = vrot.lane.b32.xlu1 %v1157_v38, %s1179_s28  ;;  %v399_v48 = vrot.slane %v1286_v11, 4  ;;  %v401_v49 = vrot.slane %v322_v13, 4  ;;  %v359_v51 = vsel %vm351_vm2, %v357_v40, %v358_v41  ;;  %v337_v52 = vrot.slane %v1335_v44, 1  ;;  %v439_v13 = vld [vmem:[%s1848_s5 + $0x90] sm:$0xff] }
   0xd   :  { %466 = vmatprep.subr.mxu0 %v1177_v7  ;;  %v382_v56 = vsel %vm374_vm3, %v380_v43, %v381_v47  ;;  %v360_v57 = vrot.slane %v1335_v44, 2  ;;  %v383_v60 = vrot.slane %v1335_v44, 3  ;;  %vm416_vm7 = vcmask 785408  }
   0xe   :  { %467 = vmatpush1.msra.mxu0 %v431_v39  ;;  %1153 = vrot.lane.b32.xlu0 %v1152_v37, %s1180_s14  ;;  %v400_v53 = vsel %vm397_vm4, %v398_v42, %v399_v48  ;;  %v1353_v54 = vsel %vm397_vm4, %v399_v48, %v401_v49  ;;  %v338_v59 = vsel %vm328_vm1, %v335_v36, %v337_v52  ;;  %v403_v29 = vrot.slane %v1293_v14, 4  ;;  %v670_v48 = vld [vmem:[%s1849_s7 + $0x68] sm:$0xff]  ;;  %v55_v49 = vld [vmem:[%s1850_s1 + $0x38] sm:$0xff]  ;;  %v669_v52 = vld [vmem:[%s1849_s7 + $0x60] sm:$0xff] }
   0xf   :  { %468 = vmatprep.subr.mxu0 %v1177_v7  ;;  %1066 = vmatprep.mubr.msk.f32.mxu0 %vm68_vm5, %v400_v53  ;;  %v361_v62 = vsel %vm351_vm2, %v358_v41, %v360_v57  ;;  %v384_v3 = vsel %vm374_vm3, %v381_v47, %v383_v60  ;;  %v404_v30 = vrot.slane %v1312_v28, 4  ;;  %v406_v39 = vrot.slane %v1335_v44, 4  ;;  %v671_v47 = vld [vmem:[%s1849_s7 + $0x70] sm:$0xff]  ;;  %v52_v53 = vld [vmem:[%s1850_s1 + $0x20] sm:$0xff]  ;;  %v49_v57 = vld [vmem:[%s1850_s1 + $0x8] sm:$0xff] }
  0x10   :  { %469 = vmatpush1.msra.mxu0 %v430_v45  ;;  %343 = vrot.lane.b32.xlu1 %v336_v46, %s1178_s25  ;;  %v666_v60 = vld [vmem:[%s1849_s7 + $0x48] sm:$0xff]  ;;  %vm1037_vm8 = vcmask 31744   ;;  %vm1042_vm9 = vcmask 48128   ;;  %vm1047_vm10 = vcmask 64512  }
  0x11   :  { %470 = vmatprep.subr.mxu0 %v1177_v7  ;;  %v405_v38 = vsel %vm397_vm4, %v403_v29, %v404_v30  ;;  %v407_v45 = vsel %vm397_vm4, %v404_v30, %v406_v39  ;;  %105 = vmatprep.subr.mxu1 %v55_v49  ;;  %v673_v29 = vld [vmem:[%s1849_s7 + $0x80] sm:$0xff] }
  0x12   :  { %471 = vmatpush1.msra.mxu0 %v429_v50  ;;  %366 = vrot.lane.b32.xlu0 %v359_v51, %s1180_s14  ;;  %v54_v50 = vld [vmem:[%s1850_s1 + $0x30] sm:$0xff]  ;;  %v53_v51 = vld [vmem:[%s1850_s1 + $0x28] sm:$0xff] }
  0x13   :  { %472 = vmatprep.subr.mxu0 %v1177_v7  ;;  %106 = vmatpush1.msra.mxu1 %v54_v50 }
  0x14   :  { %473 = vmatpush1.msra.mxu0 %v428_v55  ;;  %389 = vrot.lane.b32.xlu1 %v382_v56, %s1179_s28  ;;  %v50_v55 = vld [vmem:[%s1850_s1 + $0x10] sm:$0xff]  ;;  %v668_v56 = vld [vmem:[%s1849_s7 + $0x58] sm:$0xff] }
  0x15   :  { %474 = vmatprep.subr.mxu0 %v1177_v7  ;;  %107 = vmatprep.subr.mxu1 %v53_v51 }
  0x16   :  { %475 = vmatpush1.msra.mxu0 %v427_v58  ;;  %345 = vrot.lane.b32.xlu0 %v338_v59, %s1178_s25  ;;  %v48_v58 = vld [vmem:[%s1850_s1] sm:$0xff]  ;;  %v667_v59 = vld [vmem:[%s1849_s7 + $0x50] sm:$0xff] }
  0x17   :  { %476 = vmatprep.subr.mxu0 %v1177_v7  ;;  %108 = vmatpush1.msra.mxu1 %v52_v53 }
  0x18   :  { %477 = vmatpush1.msra.mxu0 %v426_v61  ;;  %368 = vrot.lane.b32.xlu1 %v361_v62, %s1180_s14  ;;  %v665_v61 = vld [vmem:[%s1849_s7 + $0x40] sm:$0xff]  ;;  %v664_v62 = vld [vmem:[%s1849_s7 + $0x38] sm:$0xff] }
  0x19   :  { %478 = vmatprep.subr.mxu0 %v1177_v7 }
  0x1a   :  { %479 = vmatpush1.msra.mxu0 %v425_v63  ;;  %391 = vrot.lane.b32.xlu0 %v384_v3, %s1179_s28  ;;  %v662_v63 = vld [vmem:[%s1849_s7 + $0x28] sm:$0xff]  ;;  %v660_v3 = vld [vmem:[%s1849_s7 + $0x18] sm:$0xff] }
  0x1b   :  { %480 = vmatprep.subr.mxu0 %v1177_v7 }
  0x1c   :  { %481 = vmatpush1.msra.mxu0 %v424_v4  ;;  %v658_v4 = vld [vmem:[%s1849_s7 + $0x8] sm:$0xff] }
  0x1d   :  { %482 = vmatprep.subr.mxu0 %v1177_v7 }
  0x1e   :  { %483 = vmatpush1.msra.mxu0 %v423_v6  ;;  %v1065_v6 = vld [vmem:[%s1851_s6] ss:$0 sm:$0xff] }
  0x1f   :  { %484 = vmatprep.subr.mxu0 %v1177_v7 }
  0x20   :  { %485 = vmatpush1.msra.mxu0 %v422_v8 }
  0x21   :  { %486 = vmatprep.subr.mxu0 %v1177_v7 }
  0x22   :  { %487 = vmatpush1.msra.mxu0 %v421_v9 }
  0x23   :  { %512 = vmatprep.subr.mxu0 %v1177_v7 }
  0x24   :  { %513 = vmatpush2.msra.mxu0 %v440_v10 }
  0x25   :  { %514 = vmatprep.subr.mxu0 %v1177_v7 }
  0x26   :  { %515 = vmatpush2.msra.mxu0 %v439_v13 }
  0x27   :  { %516 = vmatprep.subr.mxu0 %v1177_v7 }
  0x28   :  { %517 = vmatpush2.msra.mxu0 %v438_v15 }
  0x29   :  { %518 = vmatprep.subr.mxu0 %v1177_v7 }
  0x2a   :  { %519 = vmatpush2.msra.mxu0 %v437_v16 }
  0x2b   :  { %692 = vmatprep.subr.mxu0 %v1177_v7 }
  0x7c   :  { %v1149_v17 = vpop.permute.xlu0 %1148 }
  0x7d   :  { %v1150_v18 = vunpack.i.l.bf16 %v1149_v17  ;;  %v1151_v20 = vunpack.i.h.bf16 %v1149_v17 }
  0x7e   :  { %v1159_v19 = vpop.permute.xlu1 %1158 }
  0x7f   :  { %v1160_v22 = vunpack.i.l.bf16 %v1159_v19  ;;  %v408_v25 = vsel %vm68_vm5, %v1289_v12, %v1150_v18  ;;  %v1161_v31 = vunpack.i.h.bf16 %v1159_v19  ;;  %v409_v35 = vsel %vm68_vm5, %v1286_v11, %v1151_v20  ;;  %v676_v19 = vld [vmem:[%s1849_s7 + $0x98] sm:$0xff] }
  0x80   :  { %v1154_v21 = vpop.permute.xlu0 %1153 }
  0x81   :  { %v1156_v23 = vunpack.i.h.bf16 %v1154_v21  ;;  %v1155_v24 = vunpack.i.l.bf16 %v1154_v21 }
  0x82   :  { %v344_v26 = vpop.permute.xlu1 %343 }
  0x83   :  { %v412_v27 = vsel %vm209_vm6, %v408_v25, %v1155_v24  ;;  %v410_v33 = vsel %vm68_vm5, %v1293_v14, %v344_v26  ;;  %v413_v12 = vsel %vm209_vm6, %v409_v35, %v1156_v23 }
  0x84   :  { %v417_v32 = vsel %vm416_vm7, %v412_v27, %v1160_v22  ;;  %v367_v34 = vpop.permute.xlu0 %366  ;;  %v418_v40 = vsel %vm416_vm7, %v413_v12, %v1161_v31  ;;  %v675_v22 = vld [vmem:[%s1849_s7 + $0x90] sm:$0xff]  ;;  %v674_v27 = vld [vmem:[%s1849_s7 + $0x88] sm:$0xff] }
  0x85   :  { %521 = vmatmul.mubr.f32.vlgmr.msra.gmra.mxu0 %v417_v32  ;;  %v414_v37 = vsel %vm209_vm6, %v410_v33, %v367_v34 }
  0x86   :  { %1067 = vmatprep.mubr.msk.f32.mxu0 %vm68_vm5, %v1353_v54  ;;  %v390_v36 = vpop.permute.xlu1 %389  ;;  %v51_v54 = vld [vmem:[%s1850_s1 + $0x18] sm:$0xff]  ;;  %s1182_s1 = smov 4  }
  0x87   :  { %v419_v41 = vsel %vm416_vm7, %v414_v37, %v390_v36  ;;  %109 = vmatprep.subr.mxu1 %v51_v54 }
  0x88   :  { %v346_v14 = vpop.permute.xlu0 %345  ;;  %110 = vmatpush1.msra.mxu1 %v50_v55 }
  0x89   :  { %526 = vmatmul.mubr.f32.gmra.mxu0 %v418_v40  ;;  %v411_v11 = vsel %vm68_vm5, %v1312_v28, %v346_v14  ;;  %v672_v28 = vld [vmem:[%s1849_s7 + $0x78] sm:$0xff]  ;;  %111 = vmatprep.subr.mxu1 %v49_v57 }
  0x8a   :  { %1068 = vmatprep.mubr.msk.f32.mxu0 %vm68_vm5, %v405_v38  ;;  %v369_v42 = vpop.permute.xlu1 %368  ;;  %693 = vmatpush1.msra.mxu0 %v672_v28 }
  0x8b   :  { %v415_v43 = vsel %vm209_vm6, %v411_v11, %v369_v42  ;;  %694 = vmatprep.subr.mxu0 %v1177_v7  ;;  %112 = vmatpush1.msra.mxu1 %v48_v58 }
  0x8c   :  { %v392_v46 = vpop.permute.xlu0 %391  ;;  %695 = vmatpush1.msra.mxu0 %v671_v47  ;;  %1056 = vmatmul.mubr.msk.f32.vlgmr.msra.gmra.mxu1 %vm68_vm5, %v1256_v0  ;;  %v663_v0 = vld [vmem:[%s1849_s7 + $0x30] sm:$0xff] }
  0x8d   :  { %531 = vmatmul.mubr.f32.gmra.mxu0 %v419_v41  ;;  %v420_v44 = vsel %vm416_vm7, %v415_v43, %v392_v46  ;;  %696 = vmatprep.subr.mxu0 %v1177_v7 }
  0x8e   :  { %1069 = vmatprep.mubr.msk.f32.mxu0 %vm68_vm5, %v407_v45  ;;  %697 = vmatpush1.msra.mxu0 %v670_v48 }
  0x8f   :  { %698 = vmatprep.subr.mxu0 %v1177_v7  ;;  %151 = vmatprep.mubr.f32.mxu1 %v1177_v7 }
  0x90   :  { %699 = vmatpush1.msra.mxu0 %v669_v52  ;;  %222 = vmatprep.subr.mxu1 %v1177_v7 }
  0x91   :  { %536 = vmatmul.mubr.f32.gmra.mxu0 %v420_v44  ;;  %700 = vmatprep.subr.mxu0 %v1177_v7 }
  0x92   :  { %701 = vmatpush1.msra.mxu0 %v668_v56  ;;  %1057 = vmatmul.mubr.msk.f32.gmra.mxu1 %vm68_vm5, %v1261_v1  ;;  %v661_v1 = vld [vmem:[%s1849_s7 + $0x20] sm:$0xff] }
  0x93   :  { %702 = vmatprep.subr.mxu0 %v1177_v7  ;;  %157 = vmatprep.mubr.f32.mxu1 %v1177_v7 }
  0x94   :  { %703 = vmatpush1.msra.mxu0 %v667_v59 }
  0x95   :  { %704 = vmatprep.subr.mxu0 %v1177_v7 }
  0x96   :  { %705 = vmatpush1.msra.mxu0 %v666_v60  ;;  %1058 = vmatmul.mubr.msk.f32.gmra.mxu1 %vm68_vm5, %v1266_v2  ;;  %v659_v2 = vld [vmem:[%s1849_s7 + $0x10] sm:$0xff] }
  0x97   :  { %706 = vmatprep.subr.mxu0 %v1177_v7  ;;  %163 = vmatprep.mubr.f32.mxu1 %v1177_v7 }
  0x98   :  { %707 = vmatpush1.msra.mxu0 %v665_v61 }
  0x99   :  { %708 = vmatprep.subr.mxu0 %v1177_v7 }
  0x9a   :  { %709 = vmatpush1.msra.mxu0 %v664_v62  ;;  %1059 = vmatmul.mubr.msk.f32.gmra.mxu1 %vm68_vm5, %v1273_v5  ;;  %v657_v5 = vld [vmem:[%s1849_s7] sm:$0xff] }
  0x9b   :  { %710 = vmatprep.subr.mxu0 %v1177_v7 }
  0x9c   :  { %711 = vmatpush1.msra.mxu0 %v663_v0 }
  0x9d   :  { %712 = vmatprep.subr.mxu0 %v1177_v7 }
  0x9e   :  { %713 = vmatpush1.msra.mxu0 %v662_v63 }
  0x9f   :  { %714 = vmatprep.subr.mxu0 %v1177_v7 }
  0xa0   :  { %715 = vmatpush1.msra.mxu0 %v661_v1 }
  0xa1   :  { %716 = vmatprep.subr.mxu0 %v1177_v7 }
  0xa2   :  { %717 = vmatpush1.msra.mxu0 %v660_v3 }
  0xa3   :  { %718 = vmatprep.subr.mxu0 %v1177_v7 }
  0xa4   :  { %719 = vmatpush1.msra.mxu0 %v659_v2 }
  0xa5   :  { %720 = vmatprep.subr.mxu0 %v1177_v7 }
  0xa6   :  { %721 = vmatpush1.msra.mxu0 %v658_v4 }
  0xa7   :  { %722 = vmatprep.subr.mxu0 %v1177_v7 }
  0xa8   :  { %723 = vmatpush1.msra.mxu0 %v657_v5 }
  0xa9   :  { %748 = vmatprep.subr.mxu0 %v1177_v7 }
  0xaa   :  { %749 = vmatpush2.msra.mxu0 %v676_v19 }
  0xab   :  { %750 = vmatprep.subr.mxu0 %v1177_v7 }
  0xac   :  { %751 = vmatpush2.msra.mxu0 %v675_v22  ;;  %v187_v22 = vld [vmem:[%s1852_s3 + $0x48] sm:$0xff] }
  0xad   :  { %752 = vmatprep.subr.mxu0 %v1177_v7 }
  0xae   :  { %753 = vmatpush2.msra.mxu0 %v674_v27  ;;  %v183_v27 = vld [vmem:[%s1852_s3 + $0x28] sm:$0xff] }
  0xaf   :  { %754 = vmatprep.subr.mxu0 %v1177_v7 }
  0xb0   :  { %755 = vmatpush2.msra.mxu0 %v673_v29  ;;  %v182_v29 = vld [vmem:[%s1852_s3 + $0x20] sm:$0xff] }
 0x145   :  { %v522_v8 = vpop.f32.mrf.mxu0 }
 0x146   :  { %v523_v9 = vadd.f32 %v1065_v6, %v522_v8 }
 0x147   :  { %v524_v10 = vpop.f32.mrf.mxu0 }
 0x148   :  { %v541_v13 = vmax.f32 %v523_v9, 0.0  ;;  %v193_v9 = vld [vmem:[%s1852_s3 + $0x78] sm:$0xff]  ;;  %v192_v10 = vld [vmem:[%s1852_s3 + $0x70] sm:$0xff] }
 0x149   :  { %v527_v15 = vpop.f32.mrf.mxu0  ;;  %223 = vmatpush1.msra.mxu1 %v193_v9 }
 0x14a   :  { %v549_v16 = vrot.slane %v541_v13, 6  ;;  %v528_v17 = vadd.f32 %v1065_v6, %v527_v15  ;;  %224 = vmatprep.subr.mxu1 %v1177_v7 }
 0x14b   :  { %v529_v18 = vpop.f32.mrf.mxu0  ;;  %225 = vmatpush1.msra.mxu1 %v192_v10 }
 0x14c   :  { %v542_v20 = vmax.f32 %v528_v17, 0.0  ;;  %v1554_v23 = vsel %vm307_vm0, 0.0, %v549_v16  ;;  %v191_v17 = vld [vmem:[%s1852_s3 + $0x68] sm:$0xff]  ;;  %226 = vmatprep.subr.mxu1 %v1177_v7  ;;  %v190_v18 = vld [vmem:[%s1852_s3 + $0x60] sm:$0xff] }
 0x14d   :  { %v532_v21 = vpop.f32.mrf.mxu0  ;;  %v635_v12 = vrot.slane %v1554_v23, 4  ;;  %v591_v36 = vrot.slane %v1554_v23, 2  ;;  %v569_v41 = vrot.slane %v1554_v23, 1  ;;  %v613_v50 = vrot.slane %v1554_v23, 3  ;;  %227 = vmatpush1.msra.mxu1 %v191_v17 }
 0x14e   :  { %v550_v24 = vrot.slane %v542_v20, 6  ;;  %v533_v25 = vadd.f32 %v1065_v6, %v532_v21  ;;  %228 = vmatprep.subr.mxu1 %v1177_v7  ;;  %v189_v20 = vld [vmem:[%s1852_s3 + $0x58] sm:$0xff]  ;;  %v188_v21 = vld [vmem:[%s1852_s3 + $0x50] sm:$0xff] }
 0x14f   :  { %v534_v26 = vpop.f32.mrf.mxu0  ;;  %229 = vmatpush1.msra.mxu1 %v190_v18 }
 0x150   :  { %v1564_v30 = vsel %vm307_vm0, %v549_v16, %v550_v24  ;;  %v563_v31 = vsel %vm307_vm0, %v550_v24, 0.0  ;;  %v543_v32 = vmax.f32 %v533_v25, 0.0  ;;  %230 = vmatprep.subr.mxu1 %v1177_v7  ;;  %v186_v24 = vld [vmem:[%s1852_s3 + $0x40] sm:$0xff]  ;;  %v185_v25 = vld [vmem:[%s1852_s3 + $0x38] sm:$0xff]  ;;  %v184_v26 = vld [vmem:[%s1852_s3 + $0x30] sm:$0xff] }
 0x151   :  { %v572_v33 = vrot.slane %v563_v31, 1  ;;  %v594_v34 = vrot.slane %v563_v31, 2  ;;  %v537_v35 = vpop.f32.mrf.mxu0  ;;  %v636_v39 = vrot.slane %v1564_v30, 4  ;;  %v592_v40 = vrot.slane %v1564_v30, 2  ;;  %231 = vmatpush1.msra.mxu1 %v189_v20 }
 0x152   :  { %v552_v37 = vrot.slane %v543_v32, 6  ;;  %v538_v38 = vadd.f32 %v1065_v6, %v537_v35  ;;  %v616_v14 = vrot.slane %v563_v31, 3  ;;  %v570_v42 = vrot.slane %v1564_v30, 1  ;;  %232 = vmatprep.subr.mxu1 %v1177_v7  ;;  %v180_v32 = vld [vmem:[%s1852_s3 + $0x10] sm:$0xff]  ;;  %v201_v35 = vld [vmem:[%s1852_s3 + $0xb8] sm:$0xff] }
 0x153   :  { %v539_v11 = vpop.f32.mrf.mxu0  ;;  %v614_v43 = vrot.slane %v1564_v30, 3  ;;  %v638_v45 = vrot.slane %v563_v31, 4  ;;  %v637_v44 = vsel %vm397_vm4, %v635_v12, %v636_v39  ;;  %v593_v28 = vsel %vm351_vm2, %v591_v36, %v592_v40  ;;  %233 = vmatpush1.msra.mxu1 %v188_v21  ;;  %v181_v31 = vld [vmem:[%s1852_s3 + $0x18] sm:$0xff]  ;;  %v200_v12 = vld [vmem:[%s1852_s3 + $0xb0] sm:$0xff]  ;;  %v199_v36 = vld [vmem:[%s1852_s3 + $0xa8] sm:$0xff] }
 0x154   :  { %v544_v46 = vmax.f32 %v538_v38, 0.0  ;;  %1071 = vmatprep.mubr.msk.f32.mxu0 %vm68_vm5, %v637_v44  ;;  %v595_v47 = vsel %vm351_vm2, %v592_v40, %v594_v34  ;;  %v571_v48 = vsel %vm328_vm1, %v569_v41, %v570_v42  ;;  %v573_v49 = vsel %vm328_vm1, %v570_v42, %v572_v33  ;;  %234 = vmatprep.subr.mxu1 %v1177_v7  ;;  %v179_v33 = vld [vmem:[%s1852_s3 + $0x8] sm:$0xff]  ;;  %v178_v34 = vld [vmem:[%s1852_s3] sm:$0xff]  ;;  %v197_v38 = vld [vmem:[%s1852_s3 + $0x98] sm:$0xff] }
 0x155   :  { %v1583_v51 = vsel %vm307_vm0, 0.0, %v552_v37  ;;  %v1167_v53 = vpack.i.bf16 %v595_v47, %v593_v28  ;;  %v1162_v54 = vpack.i.bf16 %v573_v49, %v571_v48  ;;  %v615_v55 = vsel %vm374_vm3, %v613_v50, %v614_v43  ;;  %235 = vmatpush1.msra.mxu1 %v187_v22  ;;  %v195_v40 = vld [vmem:[%s1852_s3 + $0x88] sm:$0xff]  ;;  %v784_v11 = vld [vmem:[%s1853_s9 + $0x18] sm:$0xff]  ;;  %v147_v47 = vpop.f32.mrf.mxu1 }
 0x156   :  { %v553_v52 = vrot.slane %v544_v46, 6  ;;  %v617_v56 = vsel %vm374_vm3, %v614_v43, %v616_v14  ;;  %v1593_v58 = vsel %vm397_vm4, %v636_v39, %v638_v45  ;;  %v574_v59 = vrot.slane %v1583_v51, 1  ;;  %236 = vmatprep.subr.mxu1 %v1177_v7  ;;  %v196_v39 = vld [vmem:[%s1852_s3 + $0x90] sm:$0xff]  ;;  %v194_v14 = vld [vmem:[%s1852_s3 + $0x80] sm:$0xff] }
 0x157   :  { %1168 = vrot.lane.b32.xlu0 %v1167_v53, %s1180_s14  ;;  %1163 = vrot.lane.b32.xlu1 %v1162_v54, %s1178_s25  ;;  %v1172_v61 = vpack.i.bf16 %v617_v56, %v615_v55  ;;  %v596_v3 = vrot.slane %v1583_v51, 2  ;;  %v618_v2 = vrot.slane %v1583_v51, 3  ;;  %v58_v41 = vlaneseq  ;;  %v56_v45 = vld [vmem:[%s1854_s2] sm:$0x3]  ;;  %v149_v49 = vpop.f32.mrf.mxu1 }
 0x158   :  { %v1588_v57 = vsel %vm307_vm0, %v552_v37, %v553_v52  ;;  %v1601_v1 = vsel %vm307_vm0, %v553_v52, 0.0  ;;  %237 = vmatpush1.msra.mxu1 %v186_v24  ;;  %v198_v37 = vld [vmem:[%s1852_s3 + $0xa0] sm:$0xff] }
 0x159   :  { %v575_v60 = vrot.slane %v1588_v57, 1  ;;  %v597_v0 = vrot.slane %v1588_v57, 2  ;;  %v619_v63 = vrot.slane %v1588_v57, 3  ;;  %v577_v6 = vrot.slane %v1601_v1, 1  ;;  %238 = vmatprep.subr.mxu1 %v1177_v7  ;;  %v153_v53 = vpop.f32.mrf.mxu1 }
 0x15a   :  { %v599_v8 = vrot.slane %v1601_v1, 2  ;;  %v621_v16 = vrot.slane %v1601_v1, 3  ;;  %239 = vmatpush1.msra.mxu1 %v185_v25  ;;  %v59_v42 = vshrl.u32 %v58_v41, 7  ;;  %v782_v41 = vld [vmem:[%s1853_s9 + $0x8] sm:$0xff] }
 0x15b   :  { %v576_v62 = vsel %vm328_vm1, %v574_v59, %v575_v60  ;;  %1173 = vrot.lane.b32.xlu1 %v1172_v61, %s1179_s28  ;;  %v598_v4 = vsel %vm351_vm2, %v596_v3, %v597_v0  ;;  %v620_v5 = vsel %vm374_vm3, %v618_v2, %v619_v63  ;;  %v578_v13 = vsel %vm328_vm1, %v575_v60, %v577_v6  ;;  %v155_v55 = vpop.f32.mrf.mxu1 }
 0x15c   :  { %583 = vrot.lane.b32.xlu0 %v576_v62, %s1178_s25  ;;  %v600_v15 = vsel %vm351_vm2, %v597_v0, %v599_v8  ;;  %v622_v19 = vsel %vm374_vm3, %v619_v63, %v621_v16  ;;  %240 = vmatprep.subr.mxu1 %v1177_v7  ;;  %v60_v43 = vsub.s32 0, %v59_v42  ;;  %v64_v46 = vsub.s32 1, %v59_v42  ;;  %v781_v42 = vld [vmem:[%s1853_s9] sm:$0xff] }
 0x15d   :  { %241 = vmatpush1.msra.mxu1 %v184_v26  ;;  %v159_v60 = vpop.f32.mrf.mxu1 }
 0x15e   :  { %242 = vmatprep.subr.mxu1 %v1177_v7  ;;  %v61_v44 = vrot.slane %v56_v45, %v60_v43  ;;  %v65_v28 = vrot.slane %v56_v45, %v64_v46  ;;  %v900_v43 = vld [vmem:[%s1855_s11 + $0x38] sm:$0xff]  ;;  %v1060_v45 = vld [vmem:[%s1856_s4] ss:$0 sm:$0xff] }
 0x15f   :  { %605 = vrot.lane.b32.xlu1 %v598_v4, %s1180_s14  ;;  %243 = vmatpush1.msra.mxu1 %v183_v27  ;;  %v161_v0 = vpop.f32.mrf.mxu1 }
 0x160   :  { %627 = vrot.lane.b32.xlu0 %v620_v5, %s1179_s28  ;;  %244 = vmatprep.subr.mxu1 %v1177_v7  ;;  %v148_v48 = vadd.f32 %v147_v47, %v61_v44  ;;  %v150_v50 = vadd.f32 %v149_v49, %v65_v28  ;;  %v156_v56 = vadd.f32 %v155_v55, %v65_v28 }
 0x161   :  { %245 = vmatpush1.msra.mxu1 %v182_v29  ;;  %v160_v62 = vadd.f32 %v159_v60, %v61_v44  ;;  %v162_v63 = vadd.f32 %v161_v0, %v65_v28  ;;  %v165_v2 = vpop.f32.mrf.mxu1 }
 0x162   :  { %246 = vmatprep.subr.mxu1 %v1177_v7  ;;  %v170_v52 = vmax.f32 %v148_v48, 0.0  ;;  %v171_v54 = vmax.f32 %v150_v50, 0.0  ;;  %v173_v61 = vmax.f32 %v156_v56, 0.0  ;;  %v166_v5 = vadd.f32 %v165_v2, %v61_v44  ;;  %v1070_v56 = vld [vmem:[%s1857_s8] ss:$0 sm:$0xff] }
 0x163   :  { %585 = vrot.lane.b32.xlu1 %v578_v13, %s1178_s25  ;;  %247 = vmatpush1.msra.mxu1 %v181_v31  ;;  %v174_v3 = vmax.f32 %v160_v62, 0.0  ;;  %v175_v4 = vmax.f32 %v162_v63, 0.0  ;;  %v167_v6 = vpop.f32.mrf.mxu1 }
 0x164   :  { %607 = vrot.lane.b32.xlu0 %v600_v15, %s1180_s14  ;;  %248 = vmatprep.subr.mxu1 %v1177_v7  ;;  %v168_v8 = vadd.f32 %v167_v6, %v65_v28  ;;  %v176_v9 = vmax.f32 %v166_v5, 0.0  ;;  %v899_v5 = vld [vmem:[%s1855_s11 + $0x30] sm:$0xff] }
 0x165   :  { %249 = vmatpush1.msra.mxu1 %v180_v32  ;;  %1061 = vmatprep.mubr.msk.f32.mxu1 %vm209_vm6, %v171_v54 }
 0x166   :  { %250 = vmatprep.subr.mxu1 %v1177_v7  ;;  %v177_v10 = vmax.f32 %v168_v8, 0.0 }
 0x167   :  { %629 = vrot.lane.b32.xlu1 %v622_v19, %s1179_s28  ;;  %251 = vmatpush1.msra.mxu1 %v179_v33  ;;  %v641_v33 = vrot.slane %v1588_v57, 4  ;;  %s1181_s28 = smov 2  }
 0x168   :  { %252 = vmatprep.subr.mxu1 %v1177_v7 }
 0x169   :  { %253 = vmatpush1.msra.mxu1 %v178_v34 }
 0x16a   :  { %270 = vmatprep.subr.mxu1 %v1177_v7 }
 0x16b   :  { %271 = vmatpush2.msra.mxu1 %v201_v35  ;;  %v640_v35 = vrot.slane %v1583_v51, 4 }
 0x16c   :  { %272 = vmatprep.subr.mxu1 %v1177_v7 }
 0x16d   :  { %273 = vmatpush2.msra.mxu1 %v200_v12 }
 0x16e   :  { %274 = vmatprep.subr.mxu1 %v1177_v7 }
 0x16f   :  { %275 = vmatpush2.msra.mxu1 %v199_v36  ;;  %v643_v36 = vrot.slane %v1601_v1, 4 }
 0x170   :  { %276 = vmatprep.subr.mxu1 %v1177_v7 }
 0x171   :  { %277 = vmatpush2.msra.mxu1 %v198_v37  ;;  %v644_v1 = vsel %vm397_vm4, %v641_v33, %v643_v36 }
 0x172   :  { %278 = vmatprep.subr.mxu1 %v1177_v7 }
 0x173   :  { %279 = vmatpush2.msra.mxu1 %v197_v38  ;;  %v642_v38 = vsel %vm397_vm4, %v640_v35, %v641_v33 }
 0x174   :  { %280 = vmatprep.subr.mxu1 %v1177_v7 }
 0x175   :  { %281 = vmatpush2.msra.mxu1 %v196_v39 }
 0x176   :  { %282 = vmatprep.subr.mxu1 %v1177_v7 }
 0x177   :  { %283 = vmatpush2.msra.mxu1 %v195_v40 }
 0x178   :  { %284 = vmatprep.subr.mxu1 %v1177_v7  ;;  %v154_v7 = vadd.f32 %v153_v53, %v61_v44 }
 0x179   :  { %285 = vmatpush2.msra.mxu1 %v194_v14 }
 0x17a   :  { %1105 = vmatprep.subr.mxu1 %v784_v11  ;;  %v172_v59 = vmax.f32 %v154_v7, 0.0  ;;  %287 = vmatmul.mubr.f32.vlgmr.msra.gmra.mxu1 %v170_v52 }
 0x17b   :  { %1106 = vmatpush3.msra.mxu1 %v784_v11  ;;  %1062 = vmatprep.mubr.msk.f32.mxu1 %vm209_vm6, %v173_v61 }
 0x17e   :  { %292 = vmatmul.mubr.f32.gmra.mxu1 %v172_v59 }
 0x17f   :  { %1063 = vmatprep.mubr.msk.f32.mxu1 %vm209_vm6, %v175_v4 }
 0x182   :  { %297 = vmatmul.mubr.f32.gmra.mxu1 %v174_v3 }
 0x183   :  { %1064 = vmatprep.mubr.msk.f32.mxu1 %vm209_vm6, %v177_v10 }
 0x186   :  { %302 = vmatmul.mubr.f32.gmra.mxu1 %v176_v9  ;;  %v898_v9 = vld [vmem:[%s1855_s11 + $0x28] sm:$0xff] }
 0x1c9   :  { %v1169_v13 = vpop.permute.xlu0 %1168  ;;  %v1164_v15 = vpop.permute.xlu1 %1163 }
 0x1ca   :  { %v1165_v16 = vunpack.i.l.bf16 %v1164_v15  ;;  %v1170_v17 = vunpack.i.l.bf16 %v1169_v13  ;;  %v1166_v18 = vunpack.i.h.bf16 %v1164_v15  ;;  %v1171_v24 = vunpack.i.h.bf16 %v1169_v13  ;;  %v897_v15 = vld [vmem:[%s1855_s11 + $0x20] sm:$0xff] }
 0x1cc   :  { %v645_v19 = vsel %vm68_vm5, %v1554_v23, %v1165_v16  ;;  %v646_v29 = vsel %vm68_vm5, %v1564_v30, %v1166_v18 }
 0x1cd   :  { %v1174_v20 = vpop.permute.xlu1 %1173  ;;  %v649_v25 = vsel %vm209_vm6, %v645_v19, %v1170_v17  ;;  %v650_v34 = vsel %vm209_vm6, %v646_v29, %v1171_v24  ;;  %v896_v19 = vld [vmem:[%s1855_s11 + $0x18] sm:$0xff]  ;;  %v1075_v24 = vld [vmem:[%s1858_s10] ss:$0 sm:$0xff] }
 0x1ce   :  { %v584_v21 = vpop.permute.xlu0 %583  ;;  %v1175_v22 = vunpack.i.l.bf16 %v1174_v20  ;;  %v1176_v26 = vunpack.i.h.bf16 %v1174_v20  ;;  %v895_v20 = vld [vmem:[%s1855_s11 + $0x10] sm:$0xff] }
 0x1cf   :  { %v647_v23 = vsel %vm68_vm5, %v1583_v51, %v584_v21  ;;  %v894_v21 = vld [vmem:[%s1855_s11 + $0x8] sm:$0xff] }
 0x1d0   :  { %v653_v27 = vsel %vm416_vm7, %v649_v25, %v1175_v22  ;;  %v654_v12 = vsel %vm416_vm7, %v650_v34, %v1176_v26  ;;  %v893_v22 = vld [vmem:[%s1855_s11] sm:$0xff] }
 0x1d1   :  { %v606_v31 = vpop.permute.xlu1 %605  ;;  %757 = vmatmul.mubr.f32.vlgmr.msra.gmra.mxu0 %v653_v27 }
 0x1d2   :  { %v628_v32 = vpop.permute.xlu0 %627  ;;  %1072 = vmatprep.mubr.msk.f32.mxu0 %vm68_vm5, %v1593_v58  ;;  %v651_v30 = vsel %vm209_vm6, %v647_v23, %v606_v31 }
 0x1d3   :  { %v655_v40 = vsel %vm416_vm7, %v651_v30, %v628_v32  ;;  %v1080_v30 = vld [vmem:[%s1859_s12] ss:$0 sm:$0xff] }
 0x1d5   :  { %v586_v37 = vpop.permute.xlu1 %585  ;;  %762 = vmatmul.mubr.f32.gmra.mxu0 %v654_v12 }
 0x1d6   :  { %v648_v39 = vsel %vm68_vm5, %v1588_v57, %v586_v37  ;;  %1073 = vmatprep.mubr.msk.f32.mxu0 %vm68_vm5, %v642_v38  ;;  %v608_v58 = vpop.permute.xlu0 %607  ;;  %v783_v57 = vld [vmem:[%s1853_s9 + $0x10] sm:$0xff] }
 0x1d7   :  { %v652_v51 = vsel %vm209_vm6, %v648_v39, %v608_v58  ;;  %1107 = vmatprep.subr.mxu1 %v783_v57 }
 0x1d8   :  { %1108 = vmatpush3.msra.mxu1 %v783_v57 }
 0x1d9   :  { %v630_v14 = vpop.permute.xlu1 %629  ;;  %767 = vmatmul.mubr.f32.gmra.mxu0 %v655_v40  ;;  %1109 = vmatprep.subr.mxu1 %v782_v41 }
 0x1da   :  { %1074 = vmatprep.mubr.msk.f32.mxu0 %vm68_vm5, %v644_v1  ;;  %v656_v11 = vsel %vm416_vm7, %v652_v51, %v630_v14  ;;  %1110 = vmatpush3.msra.mxu1 %v782_v41 }
 0x1db   :  { %1111 = vmatprep.subr.mxu1 %v781_v42 }
 0x1dc   :  { %1112 = vmatpush3.msra.mxu1 %v781_v42 }
 0x1dd   :  { %772 = vmatmul.mubr.f32.gmra.mxu0 %v656_v11  ;;  %1119 = vmatprep.subr.mxu1 %v900_v43 }
 0x23a   :  { %v288_v46 = vpop.f32.mrf.mxu1 }
 0x23b   :  { %v1765_v44 = vadd.f32 %v1060_v45, %v288_v46 }
 0x23c   :  { %v290_v28 = vpop.f32.mrf.mxu1 }
 0x23d   :  { %1025 = vrot.lane.b32.xlu0 %v1765_v44, %s1181_s28 }
 0x23e   :  { %v293_v47 = vpop.f32.mrf.mxu1 }
 0x23f   :  { %v1769_v48 = vadd.f32 %v1060_v45, %v293_v47 }
 0x240   :  { %v295_v49 = vpop.f32.mrf.mxu1 }
 0x241   :  { %1027 = vrot.lane.b32.xlu1 %v1769_v48, %s1181_s28 }
 0x242   :  { %v298_v50 = vpop.f32.mrf.mxu1 }
 0x243   :  { %v1773_v52 = vadd.f32 %v1060_v45, %v298_v50 }
 0x244   :  { %v300_v53 = vpop.f32.mrf.mxu1 }
 0x246   :  { %v303_v54 = vpop.f32.mrf.mxu1 }
 0x247   :  { %v1775_v7 = vadd.f32 %v1060_v45, %v303_v54 }
 0x248   :  { %v305_v55 = vpop.f32.mrf.mxu1 }
 0x291   :  { %v758_v59 = vpop.f32.mrf.mxu0 }
 0x292   :  { %v759_v60 = vadd.f32 %v1070_v56, %v758_v59 }
 0x293   :  { %v760_v61 = vpop.f32.mrf.mxu0 }
 0x294   :  { %v777_v62 = vmax.f32 %v759_v60, 0.0 }
 0x295   :  { %v763_v0 = vpop.f32.mrf.mxu0 }
 0x296   :  { %v764_v63 = vadd.f32 %v1070_v56, %v763_v0  ;;  %1113 = vmatprep.mubr.msk.f32.mxu1 %vm68_vm5, %v777_v62 }
 0x297   :  { %v765_v3 = vpop.f32.mrf.mxu0 }
 0x298   :  { %v778_v2 = vmax.f32 %v764_v63, 0.0 }
 0x299   :  { %v768_v4 = vpop.f32.mrf.mxu0 }
 0x29a   :  { %v769_v6 = vadd.f32 %v1070_v56, %v768_v4  ;;  %1114 = vmatmul.mubr.msk.f32.vlgmr.msra.gmra.mxu1 %vm68_vm5, %v778_v2 }
 0x29b   :  { %v770_v8 = vpop.f32.mrf.mxu0  ;;  %1120 = vmatpush3.msra.mxu1 %v900_v43 }
 0x29c   :  { %v779_v10 = vmax.f32 %v769_v6, 0.0  ;;  %1121 = vmatprep.subr.mxu1 %v899_v5 }
 0x29d   :  { %v773_v13 = vpop.f32.mrf.mxu0  ;;  %1122 = vmatpush3.msra.mxu1 %v899_v5 }
 0x29e   :  { %v774_v16 = vadd.f32 %v1070_v56, %v773_v13  ;;  %1116 = vmatprep.mubr.msk.f32.mxu1 %vm68_vm5, %v779_v10  ;;  %1123 = vmatprep.subr.mxu1 %v898_v9 }
 0x29f   :  { %v775_v17 = vpop.f32.mrf.mxu0  ;;  %1124 = vmatpush3.msra.mxu1 %v898_v9 }
 0x2a0   :  { %v780_v18 = vmax.f32 %v774_v16, 0.0  ;;  %1125 = vmatprep.subr.mxu1 %v897_v15 }
 0x2a1   :  { %1126 = vmatpush3.msra.mxu1 %v897_v15 }
 0x2a2   :  { %1117 = vmatmul.mubr.msk.f32.gmra.mxu1 %vm68_vm5, %v780_v18  ;;  %1127 = vmatprep.subr.mxu1 %v896_v19 }
 0x2a3   :  { %1128 = vmatpush3.msra.mxu1 %v896_v19 }
 0x2a4   :  { %1129 = vmatprep.subr.mxu1 %v895_v20 }
 0x2a5   :  { %1130 = vmatpush3.msra.mxu1 %v895_v20 }
 0x2a6   :  { %1131 = vmatprep.subr.mxu1 %v894_v21 }
 0x2a7   :  { %1132 = vmatpush3.msra.mxu1 %v894_v21 }
 0x2a8   :  { %1133 = vmatprep.subr.mxu1 %v893_v22 }
 0x2a9   :  { %1134 = vmatpush3.msra.mxu1 %v893_v22 }
 0x2af   :  { %v1026_v57 = vpop.permute.xlu0 %1025 }
 0x2b3   :  { %v1028_v11 = vpop.permute.xlu1 %1027 }
 0x35a   :  { %v1115_v25 = vpop.f32.mrf.mxu1 }
 0x35b   :  { %v876_v26 = vadd.f32 %v1115_v25, %v1075_v24 }
 0x35c   :  { %v870_v27 = vpop.f32.mrf.mxu1 }
 0x35d   :  { %v871_v29 = vadd.f32 %v1075_v24, %v870_v27  ;;  %v890_v32 = vmax.f32 %v876_v26, 0.0 }
 0x35f   :  { %v889_v31 = vmax.f32 %v871_v29, 0.0 }
 0x361   :  { %1135 = vmatprep.mubr.msk.f32.mxu1 %vm209_vm6, %v889_v31 }
 0x362   :  { %v1118_v33 = vpop.f32.mrf.mxu1  ;;  %1136 = vmatmul.mubr.msk.f32.vlgmr.msra.gmra.mxu1 %vm209_vm6, %v890_v32 }
 0x363   :  { %v886_v23 = vadd.f32 %v1118_v33, %v1075_v24 }
 0x364   :  { %v880_v34 = vpop.f32.mrf.mxu1 }
 0x365   :  { %v881_v35 = vadd.f32 %v1075_v24, %v880_v34  ;;  %v892_v36 = vmax.f32 %v886_v23, 0.0 }
 0x367   :  { %v891_v12 = vmax.f32 %v881_v35, 0.0 }
 0x369   :  { %1138 = vmatprep.mubr.msk.f32.mxu1 %vm209_vm6, %v891_v12 }
 0x36a   :  { %1139 = vmatmul.mubr.msk.f32.gmra.mxu1 %vm209_vm6, %v892_v36 }
 0x422   :  { %v1137_v37 = vpop.f32.mrf.mxu1 }
 0x423   :  { %v992_v38 = vadd.f32 %v1137_v37, %v1080_v30 }
 0x424   :  { %v986_v39 = vpop.f32.mrf.mxu1 }
 0x425   :  { %v987_v58 = vadd.f32 %v1080_v30, %v986_v39  ;;  %1011 = vrot.lane.b32.xlu1 %v992_v38, %s1182_s1 }
 0x427   :  { %1009 = vrot.lane.b32.xlu0 %v987_v58, %s1182_s1 }
 0x42a   :  { %v1140_v40 = vpop.f32.mrf.mxu1 }
 0x42b   :  { %v1002_v51 = vadd.f32 %v1140_v40, %v1080_v30 }
 0x42c   :  { %v996_v14 = vpop.f32.mrf.mxu1 }
 0x42d   :  { %v997_v1 = vadd.f32 %v1080_v30, %v996_v14  ;;  %1015 = vrot.lane.b32.xlu1 %v1002_v51, %s1182_s1 }
 0x42f   :  { %1013 = vrot.lane.b32.xlu0 %v997_v1, %s1182_s1 }
 0x431   :  { %1031 = vrot.lane.b32.xlu1 %v1775_v7, %s1181_s28 }
 0x433   :  { %1029 = vrot.lane.b32.xlu0 %v1773_v52, %s1181_s28 }
 0x497   :  { %v1012_v41 = vpop.permute.xlu1 %1011 }
 0x498   :  { %v1039_v42 = vsel %vm1037_vm8, %v1769_v48, %v1012_v41 }
 0x499   :  { %v1044_v43 = vsel %vm1042_vm9, %v1039_v42, %v1028_v11  ;;  %v1010_v45 = vpop.permute.xlu0 %1009 }
 0x49a   :  { %1049 = vst.msk [vmem:[%s1860_s13 + $0x8] sm:$0xff] %vm1047_vm10, %v1044_v43  ;;  %v1038_v46 = vsel %vm1037_vm8, %v1765_v44, %v1010_v45 }
 0x49b   :  { %v1043_v28 = vsel %vm1042_vm9, %v1038_v46, %v1026_v57 }
 0x49c   :  { %1048 = vst.msk [vmem:[%s1860_s13] sm:$0xff] %vm1047_vm10, %v1043_v28 }
 0x49f   :  { %v1016_v47 = vpop.permute.xlu1 %1015 }
 0x4a0   :  { %v1041_v49 = vsel %vm1037_vm8, %v1775_v7, %v1016_v47 }
 0x4a1   :  { %v1014_v48 = vpop.permute.xlu0 %1013 }
 0x4a2   :  { %v1040_v54 = vsel %vm1037_vm8, %v1773_v52, %v1014_v48 }
 0x4a3   :  { %v1032_v50 = vpop.permute.xlu1 %1031 }
 0x4a4   :  { %v1046_v53 = vsel %vm1042_vm9, %v1041_v49, %v1032_v50 }
 0x4a5   :  { %1051 = vst.msk [vmem:[%s1860_s13 + $0x18] sm:$0xff] %vm1047_vm10, %v1046_v53  ;;  %v1030_v44 = vpop.permute.xlu0 %1029 }
 0x4a6   :  { %v1045_v55 = vsel %vm1042_vm9, %v1040_v54, %v1030_v44 }
 0x4a7   :  { %1050 = vst.msk [vmem:[%s1860_s13 + $0x10] sm:$0xff] %vm1047_vm10, %v1045_v55 }

</bundles_post_ra>
